<compile_context>
chip_gen: v7x
topology: tpu7x:2x2x1
jax: 0.10.0
libtpu: 0.0.40
codegen_flags: <defaults>
</compile_context>

<pallas_src>
import jax
import jax.numpy as jnp
from jax.experimental import pallas as pl
from jax.experimental.pallas import tpu as pltpu


# ------------------------------------------------------------------ Identity ---
def identity_forward(x):
    # nn.Identity: returning the input is exact and costs zero HBM traffic
    # (per perf review: do not launch a copy kernel for a no-op).
    return x


# ------------------------------------------------------------- tiling helper ---
def _pick_hw_tile(c, hw, itemsize, budget_bytes=2 << 20):
    """Largest multiple-of-128 divisor of hw whose (c, tile) slab fits the budget."""
    if hw < 128:
        # TODO(synk): for tiny feature maps (7x7 / 8x8) a (HW, C)-on-lanes layout
        # would avoid narrow-lane masked stores; not needed for the tested shapes.
        return hw
    max_elems = max(budget_bytes // max(c * itemsize, 1), 128)
    best = 0
    t = 128
    while t <= hw:
        if hw % t == 0 and t <= max_elems:
            best = t
        t += 128
    return best if best > 0 else hw


# --------------------------------------------------- pass 1: channel SE (cSE) ---
def _make_cse_kernel(inv_hw):
    def kernel(x_ref, w1_ref, b1_ref, w2_ref, b2_ref, catt_ref, acc_ref):
        j = pl.program_id(1)

        @pl.when(j == 0)
        def _():
            acc_ref[...] = jnp.zeros_like(acc_ref)

        x = x_ref[0].astype(jnp.float32)                       # (C, THW)
        acc_ref[...] += jnp.sum(x, axis=1, keepdims=True)      # (C, 1)

        @pl.when(j == pl.num_programs(1) - 1)
        def _():
            pooled = acc_ref[...] * inv_hw                     # global avg pool (C, 1)
            z = jnp.dot(w1_ref[...], pooled,
                        preferred_element_type=jnp.float32) + b1_ref[...]   # (mid, 1)
            z = jnp.maximum(z, 0.0)                            # ReLU
            catt_ref[0] = jax.nn.sigmoid(
                jnp.dot(w2_ref[...], z,
                        preferred_element_type=jnp.float32) + b2_ref[...])  # (C, 1)

    return kernel


# ------------------------------------ pass 2: spatial SE + fused recalibration ---
def _recal_kernel(x_ref, catt_ref, ws_ref, bs_ref, o_ref):
    x = x_ref[0].astype(jnp.float32)                           # (C, THW)
    s_att = jax.nn.sigmoid(
        jnp.dot(ws_ref[...], x,
                preferred_element_type=jnp.float32) + bs_ref[...])          # (1, THW)
    # fused: x*cSE + x*sSE == x * (cSE + sSE)  -> one multiply per tile
    o_ref[0] = (x * (catt_ref[0] + s_att)).astype(o_ref.dtype)


def scse_forward(x, w1, b1, w2, b2, ws, bs, *, hw_tile=None):
    n, c, h, w = x.shape
    hw = h * w
    mid = w1.shape[0]
    itemsize = x.dtype.itemsize

    if hw_tile is None:
        hw_tile = _pick_hw_tile(c, hw, itemsize)
    assert hw % hw_tile == 0, "hw_tile must divide H*W"
    hw_tiles = hw // hw_tile

    x3 = x.reshape(n, c, hw)                                   # spatial on lanes
    w1f = w1.astype(jnp.float32)
    b1c = b1.reshape(mid, 1).astype(jnp.float32)
    w2f = w2.astype(jnp.float32)
    b2c = b2.reshape(c, 1).astype(jnp.float32)
    wsr = ws.reshape(1, c).astype(jnp.float32)
    bsr = bs.reshape(1, 1).astype(jnp.float32)

    # Explicit VMEM budget: 2x double-buffered in + out slabs + params + slack,
    # floored at 32 MiB (>= default) and capped at 64 MiB (v7x per-TC physical).
    slab = c * hw_tile * itemsize
    params_bytes = 4 * (w1f.size + b1c.size + w2f.size + b2c.size + wsr.size + bsr.size)
    vmem_limit = int(min(max(8 * slab + 2 * params_bytes + (4 << 20), 32 << 20), 64 << 20))

    # ---- pass 1: stream x once, produce per-batch channel attention (N, C, 1) ----
    c_att = pl.pallas_call(
        _make_cse_kernel(1.0 / float(hw)),
        out_shape=jax.ShapeDtypeStruct((n, c, 1), jnp.float32),
        grid=(n, hw_tiles),
        in_specs=[
            pl.BlockSpec((1, c, hw_tile), lambda i, j: (i, 0, j)),   # x tile
            pl.BlockSpec((mid, c), lambda i, j: (0, 0)),             # w1 (mid, C)
            pl.BlockSpec((mid, 1), lambda i, j: (0, 0)),             # b1
            pl.BlockSpec((c, mid), lambda i, j: (0, 0)),             # w2 (C, mid)
            pl.BlockSpec((c, 1), lambda i, j: (0, 0)),               # b2
        ],
        out_specs=pl.BlockSpec((1, c, 1), lambda i, j: (i, 0, 0)),
        scratch_shapes=[pltpu.VMEM((c, 1), jnp.float32)],
        compiler_params=pltpu.CompilerParams(
            dimension_semantics=("parallel", "arbitrary"),
            vmem_limit_bytes=vmem_limit),
    )(x3, w1f, b1c, w2f, b2c)

    # ---- pass 2: stream x again, sSE + fused recalibration, HW-tiled ------------
    out = pl.pallas_call(
        _recal_kernel,
        out_shape=jax.ShapeDtypeStruct((n, c, hw), x.dtype),
        grid=(n, hw_tiles),
        in_specs=[
            pl.BlockSpec((1, c, hw_tile), lambda i, j: (i, 0, j)),   # x tile
            pl.BlockSpec((1, c, 1), lambda i, j: (i, 0, 0)),         # c_att
            pl.BlockSpec((1, c), lambda i, j: (0, 0)),               # ws (1, C)
            pl.BlockSpec((1, 1), lambda i, j: (0, 0)),               # bs
        ],
        out_specs=pl.BlockSpec((1, c, hw_tile), lambda i, j: (i, 0, j)),
        compiler_params=pltpu.CompilerParams(
            dimension_semantics=("parallel", "parallel"),
            vmem_limit_bytes=vmem_limit),
    )(x3, c_att, wsr, bsr)
    return out.reshape(n, c, h, w)


# --------------------------------------------------------------- module front ---
def attention_forward(x, name=None, params=None, **kw):
    """Matches Attention.forward: Identity for name=None, SCSE for name='scse'."""
    if name is None:
        return identity_forward(x)
    elif name == 'scse':
        return scse_forward(x, **params, **kw)
    raise ValueError('Attention {} is not implemented'.format(name))


# ----------------------------------------------------------------- reference ---
def scse_reference(x, w1, b1, w2, b2, ws, bs):
    pooled = jnp.mean(x, axis=(2, 3))                                   # (N, C)
    z = jnp.maximum(pooled @ w1.T + b1, 0.0)                            # (N, mid)
    c_att = jax.nn.sigmoid(z @ w2.T + b2)                               # (N, C)
    s_att = jax.nn.sigmoid(
        jnp.einsum('nchw,c->nhw', x, ws.reshape(-1)) + bs.reshape(()))  # (N, H, W)
    return x * c_att[:, :, None, None] + x * s_att[:, None, :, :]


if __name__ == "__main__":
    key = jax.random.PRNGKey(0)
    N, C, H, W = 2, 4, 16, 16
    reduction = 2
    mid = C // reduction

    k_x, k_w1, k_b1, k_w2, k_b2, k_ws, k_bs = jax.random.split(key, 7)
    x = jax.random.normal(k_x, (N, C, H, W), dtype=jnp.float32)

    # 1x1 Conv2d weights stored flattened as (out_channels, in_channels); per-out biases.
    w1 = jax.random.normal(k_w1, (mid, C), jnp.float32) * 0.5
    b1 = jax.random.normal(k_b1, (mid,), jnp.float32) * 0.1
    w2 = jax.random.normal(k_w2, (C, mid), jnp.float32) * 0.5
    b2 = jax.random.normal(k_b2, (C,), jnp.float32) * 0.1
    ws = jax.random.normal(k_ws, (1, C), jnp.float32) * 0.5
    bs = jax.random.normal(k_bs, (1,), jnp.float32) * 0.1
    params = dict(w1=w1, b1=b1, w2=w2, b2=b2, ws=ws, bs=bs)

    # Branch 1: Attention(name=None) == nn.Identity (no kernel, zero cost)
    y_id = attention_forward(x, name=None)
    assert y_id.shape == x.shape
    assert jnp.array_equal(y_id, x), "identity branch mismatch"

    ref = scse_reference(x, **params)

    # Branch 2: Attention(name='scse') == SCSEModule, default (single) HW tile
    y = jax.block_until_ready(attention_forward(x, name='scse', params=params))
    assert y.shape == x.shape
    assert jnp.allclose(y, ref, atol=1e-5, rtol=1e-5), "scse mismatch (default tile)"

    # Forced multi-tile HW path (exercises the streamed mean accumulation)
    y_tiled = jax.block_until_ready(scse_forward(x, **params, hw_tile=128))
    assert jnp.allclose(y_tiled, ref, atol=1e-5, rtol=1e-5), "scse mismatch (hw_tile=128)"

    # bf16 I/O path (bandwidth optimization on v6e/v7x); math stays f32 in VMEM
    x_bf = x.astype(jnp.bfloat16)
    y_bf = jax.block_until_ready(scse_forward(x_bf, **params))
    ref_bf = scse_reference(x_bf.astype(jnp.float32), **params)
    assert y_bf.dtype == jnp.bfloat16
    assert jnp.allclose(y_bf.astype(jnp.float32), ref_bf, atol=6e-2, rtol=6e-2), \
        "scse mismatch (bf16 I/O)"

    print("KERNEL_OK")
</pallas_src>

<mosaic_0001>
module attributes {stable_mosaic.version = 11 : i64} {
  func.func @kernel(%arg0: i32, %arg1: i32, %arg2: memref<1x4x256xf32, #tpu.memory_space<vmem>>, %arg3: memref<2x4xf32, #tpu.memory_space<vmem>>, %arg4: memref<2x1xf32, #tpu.memory_space<vmem>>, %arg5: memref<4x2xf32, #tpu.memory_space<vmem>>, %arg6: memref<4x1xf32, #tpu.memory_space<vmem>>, %arg7: memref<1x4x1xf32, #tpu.memory_space<vmem>>, %arg8: memref<4x1xf32, #tpu.memory_space<vmem>>) attributes {dimension_semantics = [#tpu.dimension_semantics<parallel>, #tpu.dimension_semantics<arbitrary>], iteration_bounds = array<i64: 2, 1>, scalar_prefetch = 0 : i64, scratch_operands = 1 : i64, tpu.core_type = #tpu.core_type<tc>, window_params = [{transform_indices = @transform_0, window_bounds = array<i64: 1, 4, 256>}, {pipeline_mode = #tpu.pipeline_mode<synchronous>, transform_indices = @transform_1, window_bounds = array<i64: 2, 4>}, {pipeline_mode = #tpu.pipeline_mode<synchronous>, transform_indices = @transform_2, window_bounds = array<i64: 2, 1>}, {pipeline_mode = #tpu.pipeline_mode<synchronous>, transform_indices = @transform_3, window_bounds = array<i64: 4, 2>}, {pipeline_mode = #tpu.pipeline_mode<synchronous>, transform_indices = @transform_4, window_bounds = array<i64: 4, 1>}, {transform_indices = @transform_5, window_bounds = array<i64: 1, 4, 1>}]} {
    %c0_i32 = arith.constant 0 : i32
    %0 = arith.cmpi eq, %arg1, %c0_i32 : i32
    %1 = arith.extui %0 : i1 to i32
    %c0_i32_0 = arith.constant 0 : i32
    %2 = arith.cmpi ne, %1, %c0_i32_0 : i32
    scf.if %2 {
      %cst_9 = arith.constant 0.000000e+00 : f32
      %13 = vector.broadcast %cst_9 : f32 to vector<4x1xf32>
      %c0_10 = arith.constant 0 : index
      %c0_11 = arith.constant 0 : index
      %14 = vector.load %arg8[%c0_10, %c0_11] : memref<4x1xf32, #tpu.memory_space<vmem>>, vector<4x1xf32>
      tpu.vector_store %arg8[%c0_10, %c0_11], %13 {strides = array<i32>} : memref<4x1xf32, #tpu.memory_space<vmem>>, vector<4x1xf32>,
    } else {
    }
    %c0 = arith.constant 0 : index
    %c0_1 = arith.constant 0 : index
    %c0_2 = arith.constant 0 : index
    %3 = vector.load %arg2[%c0, %c0_1, %c0_2] : memref<1x4x256xf32, #tpu.memory_space<vmem>>, vector<1x4x256xf32>
    %4 = vector.shape_cast %3 : vector<1x4x256xf32> to vector<4x256xf32>
    %c0_3 = arith.constant 0 : index
    %c0_4 = arith.constant 0 : index
    %5 = vector.load %arg8[%c0_3, %c0_4] : memref<4x1xf32, #tpu.memory_space<vmem>>, vector<4x1xf32>
    %cst = arith.constant dense<0.000000e+00> : vector<4xf32>
    %6 = vector.multi_reduction <add>, %4, %cst [1] : vector<4x256xf32> to vector<4xf32>
    %7 = vector.shape_cast %6 : vector<4xf32> to vector<4x1xf32>
    %8 = arith.addf %5, %7 : vector<4x1xf32>
    %c0_5 = arith.constant 0 : index
    %c0_6 = arith.constant 0 : index
    %9 = vector.load %arg8[%c0_5, %c0_6] : memref<4x1xf32, #tpu.memory_space<vmem>>, vector<4x1xf32>
    tpu.vector_store %arg8[%c0_5, %c0_6], %8 {strides = array<i32>} : memref<4x1xf32, #tpu.memory_space<vmem>>, vector<4x1xf32>,
    %c0_i32_7 = arith.constant 0 : i32
    %10 = arith.cmpi eq, %arg1, %c0_i32_7 : i32
    %11 = arith.extui %10 : i1 to i32
    %c0_i32_8 = arith.constant 0 : i32
    %12 = arith.cmpi ne, %11, %c0_i32_8 : i32
    scf.if %12 {
      %c0_9 = arith.constant 0 : index
      %c0_10 = arith.constant 0 : index
      %13 = vector.load %arg8[%c0_9, %c0_10] : memref<4x1xf32, #tpu.memory_space<vmem>>, vector<4x1xf32>
      %cst_11 = arith.constant 3.906250e-03 : f32
      %14 = vector.broadcast %cst_11 : f32 to vector<4x1xf32>
      %15 = arith.mulf %13, %14 : vector<4x1xf32>
      %c0_12 = arith.constant 0 : index
      %c0_13 = arith.constant 0 : index
      %16 = vector.load %arg3[%c0_12, %c0_13] : memref<2x4xf32, #tpu.memory_space<vmem>>, vector<2x4xf32>
      %cst_14 = arith.constant dense<0.000000e+00> : vector<2x1xf32>
      %17 = tpu.matmul %16, %15, %cst_14 {dimension_numbers = #tpu.dot_dimension_numbers<[1], [0], [0], [1], [0, 0, 1, 1], [], []>} : vector<2x4xf32>, vector<4x1xf32>, vector<2x1xf32> -> vector<2x1xf32>
      %c0_15 = arith.constant 0 : index
      %c0_16 = arith.constant 0 : index
      %18 = vector.load %arg4[%c0_15, %c0_16] : memref<2x1xf32, #tpu.memory_space<vmem>>, vector<2x1xf32>
      %19 = arith.addf %17, %18 : vector<2x1xf32>
      %cst_17 = arith.constant 0.000000e+00 : f32
      %20 = vector.broadcast %cst_17 : f32 to vector<2x1xf32>
      %21 = arith.maximumf %19, %20 : vector<2x1xf32>
      %c0_18 = arith.constant 0 : index
      %c0_19 = arith.constant 0 : index
      %22 = vector.load %arg5[%c0_18, %c0_19] : memref<4x2xf32, #tpu.memory_space<vmem>>, vector<4x2xf32>
      %cst_20 = arith.constant dense<0.000000e+00> : vector<4x1xf32>
      %23 = tpu.matmul %22, %21, %cst_20 {dimension_numbers = #tpu.dot_dimension_numbers<[1], [0], [0], [1], [0, 0, 1, 1], [], []>} : vector<4x2xf32>, vector<2x1xf32>, vector<4x1xf32> -> vector<4x1xf32>
      %c0_21 = arith.constant 0 : index
      %c0_22 = arith.constant 0 : index
      %24 = vector.load %arg6[%c0_21, %c0_22] : memref<4x1xf32, #tpu.memory_space<vmem>>, vector<4x1xf32>
      %25 = arith.addf %23, %24 : vector<4x1xf32>
      %26 = arith.negf %25 : vector<4x1xf32>
      %27 = math.exp %26 : vector<4x1xf32>
      %cst_23 = arith.constant 1.000000e+00 : f32
      %28 = vector.broadcast %cst_23 : f32 to vector<4x1xf32>
      %29 = arith.addf %28, %27 : vector<4x1xf32>
      %30 = arith.divf %28, %29 : vector<4x1xf32>
      %c0_24 = arith.constant 0 : index
      %c0_25 = arith.constant 0 : index
      %c0_26 = arith.constant 0 : index
      %31 = vector.load %arg7[%c0_24, %c0_25, %c0_26] : memref<1x4x1xf32, #tpu.memory_space<vmem>>, vector<1x4x1xf32>
      %32 = vector.shape_cast %31 : vector<1x4x1xf32> to vector<4x1xf32>
      %33 = vector.shape_cast %30 : vector<4x1xf32> to vector<1x4x1xf32>
      tpu.vector_store %arg7[%c0_24, %c0_25, %c0_26], %33 {strides = array<i32>} : memref<1x4x1xf32, #tpu.memory_space<vmem>>, vector<1x4x1xf32>,
    } else {
    }
    return
  }
  func.func @transform_0(%arg0: i32, %arg1: i32) -> (i32, i32, i32) {
    %c0_i32 = arith.constant 0 : i32
    %c0_i32_0 = arith.constant 0 : i32
    return %arg0, %c0_i32, %arg1 : i32, i32, i32
  }
  func.func @transform_1(%arg0: i32, %arg1: i32) -> (i32, i32) {
    %c0_i32 = arith.constant 0 : i32
    %c0_i32_0 = arith.constant 0 : i32
    %c0_i32_1 = arith.constant 0 : i32
    return %c0_i32, %c0_i32_0 : i32, i32
  }
  func.func @transform_2(%arg0: i32, %arg1: i32) -> (i32, i32) {
    %c0_i32 = arith.constant 0 : i32
    %c0_i32_0 = arith.constant 0 : i32
    %c0_i32_1 = arith.constant 0 : i32
    return %c0_i32, %c0_i32_0 : i32, i32
  }
  func.func @transform_3(%arg0: i32, %arg1: i32) -> (i32, i32) {
    %c0_i32 = arith.constant 0 : i32
    %c0_i32_0 = arith.constant 0 : i32
    %c0_i32_1 = arith.constant 0 : i32
    return %c0_i32, %c0_i32_0 : i32, i32
  }
  func.func @transform_4(%arg0: i32, %arg1: i32) -> (i32, i32) {
    %c0_i32 = arith.constant 0 : i32
    %c0_i32_0 = arith.constant 0 : i32
    %c0_i32_1 = arith.constant 0 : i32
    return %c0_i32, %c0_i32_0 : i32, i32
  }
  func.func @transform_5(%arg0: i32, %arg1: i32) -> (i32, i32, i32) {
    %c0_i32 = arith.constant 0 : i32
    %c0_i32_0 = arith.constant 0 : i32
    %c0_i32_1 = arith.constant 0 : i32
    return %arg0, %c0_i32, %c0_i32_0 : i32, i32, i32
  }
}

</mosaic_0001>

<bundles_post_ra>
// kernel: tpu_custom_call.1
= control target key start
LH: loop header
LB: loop body
LE: loop exit
PB: predicated region body
PF: predicated region fallthrough
CT: control target
= control target key end

     0   :  { %10 = vsyncpa [#allocation4], 0  ;;  %s878_s0 = inlined_call_operand.hbm [shape: f32[2,4,256], index: 0, kind: input, shape index: {}]   ;;  %s879_s1 = inlined_call_operand.vmem [shape: f32[2,4], index: 1, kind: input, shape index: {}]   ;;  %s880_s2 = inlined_call_operand.vmem [shape: f32[2,1], index: 2, kind: input, shape index: {}]   ;;  %s881_s3 = inlined_call_operand.vmem [shape: f32[4,2], index: 3, kind: input, shape index: {}]   ;;  %s882_s4 = inlined_call_operand.vmem [shape: f32[4,1], index: 4, kind: input, shape index: {}]   ;;  %s883_s5 = inlined_call_operand.vmem [shape: f32[2,4,1], index: 5, kind: output, shape index: {}]  }
   0x1   :  { %12 = vsyncpa [#allocation4 + $0x1], 0  ;;  %s735_s18 = smov 0   ;;  %s737_s19 = smov 0  }
   0x2   :  { %s739_s20 = smov 0   ;;  %s741_s21 = smov 0  }
   0x3   :  { %s743_s22 = smov 0   ;;  %s745_s23 = smov 0  }
   0x4 LB: > { %s526_s24 = sadd.s32 4294967295, %s700_s23   ;;  %s30_s25 = sadd.s32 1, %s696_s22  ;;  %s700_s23 = sphi %s745_s23, %s18_s23   ;;  %s696_s22 = sphi %s743_s22, %s893_s22   ;;  %s692_s21 = sphi %s741_s21, %s892_s21   ;;  %s688_s20 = sphi %s739_s20, %s891_s20   ;;  %s684_s19 = sphi %s737_s19, %s890_s19   ;;  %s680_s18 = sphi %s735_s18, %s889_s18  }
   0x5   : > { %p32_p0 = scmp.ge.s32.totalorder %s30_s25, 2  ;;  %s39_s26 = sadd.s32 1, %s688_s20 }
   0x6   : > { %p46_p1 = scmp.ne.s32.totalorder %s688_s20, %s684_s19  ;;  %p47_p2 = scmp.eq.s32.totalorder %s700_s23, 0 }
   0x7   : > { %s895_s25 = smov (%p32_p0, %s30_s25), 0  ;;  %p52_p4 = scmp.ne.s32.totalorder %s684_s19, %s680_s18 }
   0x8   : > { %p771_p3 = por %p47_p2, %p46_p1  ;;  %s34_s28 = ssub.s32 %s696_s22, %s895_s25 }
   0x9   : > { %p53_p5 = scmp.eq.s32.totalorder %s526_s24, 0  ;;  %p37_p6 = scmp.eq.s32.totalorder %s34_s28, 0 }
   0xa   : > { %p564_p8 = scmp.lt.s32.totalorder %s700_s23, 2  ;;  %s198_s6 = sand.u32 1, %s688_s20  }
   0xb   : > { %p778_p7 = por %p53_p5, %p52_p4  ;;  %s543_s7 = sshll.u32 %s696_s22, 7 }
   0xc   : > { %s784_s30 = scalar_select %p37_p6, %s688_s20, %s39_s26  }
   0xd   : > { %s530_s8 = sshll.u32 %s198_s6, 3  ;;  %s791_s11 = scalar_lea.hbm %s878_s0, %s543_s7 }
   0xe   : > { %s202_s12 = scalar_lea.vmem [#allocation3], %s530_s8  ;;  %p795_p9 = pnand %p564_p8, %p771_p3 }
   0xf   : > { %s212_s13 = sshll.u32 %s202_s12, 4  ;;  %s199_s15 = scalar_lea.sflag [#allocation4], %s198_s6  ;;  %s799_s13 = int_to_ptr.vmem [resolvable:$true] %s212_s13 }
  0x10   : > { %s620_s16 = scalar_lea.hbm %s791_s11, 128  ;;  %p622_p13 = pneg %p795_p9 }
  0x11   : > { %p621_p12 = scmp.ne.s32.totalorder %s791_s11, %s620_s16  ;;  %s625_s24 = scalar_lea.hbm %s878_s0, 256 }
  0x12   : > { %p626_p2 = scmp.lt.u32.totalorder %s791_s11, %s878_s0  ;;  %p627_p3 = scmp.lt.u32.totalorder %s625_s24, %s620_s16 }
  0x13   : > { %p623_p0 = pnand %p622_p13, %p621_p12  ;;  %p629_p5 = scmp.lt.u32.totalorder %s620_s16, %s791_s11 }
  0x14   : > { %p628_p4 = por %p627_p3, %p626_p2 }
  0x15   : > { %p624_p1 = pneg %p623_p0 }
  0x16   : > { %p630_p6 = por %p629_p5, %p628_p4 }
  0x18   : > { %p631_p8 = pnand %p630_p6, %p624_p1 }
  0x1a   : > { %634 = shalt.err (!%p631_p8)
}
  0x1b   : > { %s635_s28 = scalar_lea.vmem %s799_s13, 128  ;;  %s702_s6 = smov [#allocation3]  }
  0x1c   : > { %p636_p12 = scmp.ne.s32.totalorder %s799_s13, %s635_s28  ;;  %s640_s7 = sshll.u32 %s702_s6, 4  ;;  %s641_s7 = int_to_ptr.vmem [resolvable:$false] %s640_s7 }
  0x1d   : > { %s642_s8 = scalar_lea.vmem %s641_s7, 256  ;;  %p643_p11 = scmp.lt.s32.totalorder %s799_s13, %s641_s7 }
  0x1e   : > { %p638_p0 = pnand %p636_p12, %p622_p13  ;;  %p644_p2 = scmp.lt.s32.totalorder %s642_s8, %s635_s28 }
  0x20   : > { %p639_p10 = pneg %p638_p0  ;;  %p645_p3 = por %p644_p2, %p643_p11 }
  0x22   : > { %p646_p4 = pnand %p645_p3, %p639_p10 }
  0x24   : > { %649 = shalt.err (!%p646_p4)
}
  0x25   : > { %563 = dma.hbm_to_vmem [thread:$0]  (!%p795_p9), %s791_s11, 128, %s799_s13, %s199_s15  }
  0x26   : > { %p887_p1 = scmp.lt.s32.totalorder %s700_s23, 3  ;;  %p888_p5 = scmp.ge.s32.totalorder %s700_s23, 1 }
  0x28   : > { %p218_p13 = pnand %p888_p5, %p887_p1 }
  0x29   : > { %s223_s9 = sand.u32 (!%p218_p13), 1, %s684_s19  }
  0x2a   : > { %221 = sbr.rel (%p218_p13) target bundleno = 669 (0x29d), region = 40  ;;  %s534_s10 = sshll.u32 (!%p218_p13), %s223_s9, 3 }
  0x2b   : > { %s224_s12 = scalar_lea.sflag (!%p218_p13), [#allocation4], %s223_s9  ;;  %s227_s16 = scalar_lea.vmem (!%p218_p13), [#allocation3], %s534_s10 }
  0x31   : > { %675 = dma.done.wait (%p778_p7), %s224_s12, 128  }
  0x32   : > { %677 = vsyncadd (%p778_p7), %s224_s12, 4294967168  ;;  %vm262_vm0 = vcmask 3072   ;;  %v703_v0 = vmov 0.0   ;;  %vm269_vm1 = vcmask 1043456   ;;  %v264_v1 = vld [vmem:[%s227_s16] sm:$0xff]  ;;  %vm704_vm2 = vmmov 0  }
  0x33   : > { %263 = vst.msk [vmem:[#allocation2] sm:$0xf] %vm262_vm0, %v703_v0  ;;  %548 = vmatprep.subr.mxu0 %v703_v0  ;;  %553 = vmatprep.subr.mxu1 %v703_v0  ;;  %v267_v2 = vcombine.high %v264_v1, %v264_v1  ;;  %v270_v3 = vsel %vm269_vm1, %v264_v1, 0.0  ;;  %v283_v11 = vld [vmem:[%s879_s1] sm:$0x3]  ;;  %vm285_vm3 = vcmask 31744  }
  0x34   : > { %550 = vmatprep.mubr.msk.f32.mxu0 %vm704_vm2, %v703_v0  ;;  %555 = vmatprep.mubr.msk.f32.mxu1 %vm704_vm2, %v703_v0  ;;  %v284_v12 = vld [vmem:[%s880_s2] sm:$0x3]  ;;  %vm369_vm4 = vcmask 1041408   ;;  %vm365_vm5 = vcmask 15360   ;;  %p254_p7 = scmp.lt.s32.totalorder %s692_s21, 1 }
  0x35   : > { %v271_v4 = vsel %vm269_vm1, %v267_v2, 0.0  ;;  %v363_v17 = vld [vmem:[%s881_s3] sm:$0xf] }
  0x36   : > { %v272_v5 = vadd.f32 %v271_v4, %v270_v3  ;;  %v364_v18 = vld [vmem:[%s882_s4] sm:$0xf]  ;;  %s897_s21 = smov (!%p254_p7, %s692_s21), 1 }
  0x37   : > { %s535_s26 = sshll.u32 %s897_s21, 2 }
  0x38   : > { %273 = vadd.xlane.f32.xlu0 %v272_v5  ;;  %s257_s6 = scalar_lea.vmem %s883_s5, %s535_s26 }
  0x3a   : > { %v265_v6 = vld [vmem:[#allocation2] sm:$0xf] }
  0xc5   : > { %v274_v7 = vpop.xlane.xlu0 %273 }
  0xc6   : > { %v275_v8 = vadd.f32 %v274_v7, %v265_v6 }
  0xc8   : > { %277 = vst.msk [vmem:[#allocation2] sm:$0xf] %vm262_vm0, %v275_v8 }
  0xcf   : > { %v281_v9 = vld [vmem:[#allocation2] sm:$0xf] }
  0xd0   : > { %v282_v10 = vmul.f32 0.00390625, %v281_v9 }
  0xd2   : > { %549 = vmatpush3.msk.msra.mxu0 %vm269_vm1, %v282_v10 }
  0xd3   : > { %551 = vmatmul.mubr.msk.f32.vlgmr.msra.gmra.mrb[0].mxu0 %vm285_vm3, %v283_v11 }
 0x1a6   : > { %v358_v13 = vpop.f32.mrb[0].mxu0 }
 0x1a7   : > { %v359_v14 = vadd.f32 %v358_v13, %v284_v12  ;;  %v552_v15 = vpop.f32.mrb[1].mxu0 }
 0x1a9   : > { %v362_v16 = vmax.f32 %v359_v14, 0.0 }
 0x1ab   : > { %554 = vmatpush3.msk.msra.mxu1 %vm369_vm4, %v362_v16 }
 0x1ac   : > { %556 = vmatmul.mubr.msk.f32.vlgmr.msra.gmra.mrb[0].mxu1 %vm365_vm5, %v363_v17 }
 0x27f   : > { %v439_v19 = vpop.f32.mrb[0].mxu1 }
 0x280   : > { %v440_v20 = vadd.f32 %v439_v19, %v364_v18  ;;  %v557_v21 = vpop.f32.mrb[1].mxu1 }
 0x282   : > { %v540_v22 = vmul.f32 -1.442695, %v440_v20 }
 0x284   : > { %616 = vpow2.f32 %v540_v22 }
 0x28e   : > { %v617_v23 = vpop.eup %616 }
 0x28f   : > { %v446_v24 = vadd.f32 1.0, %v617_v23 }
 0x291   : > { %618 = vrcp.f32 %v446_v24 }
 0x29b   : > { %v619_v25 = vpop.eup %618 }
 0x29c   : > { %449 = vst.msk [vmem:[%s257_s6] sm:$0xf] %vm262_vm0, %v619_v25 }
 0x29d PF: > { %s18_s23 = sadd.s32 1, %s700_s23   ;;  %s889_s18 = smov %s684_s19 }
 0x29e   : > { %p15_p9 = scmp.ge.s32.totalorder %s18_s23, 4   ;;  %s890_s19 = smov %s688_s20 }
 0x29f   : > { %s891_s20 = smov %s784_s30  ;;  %s892_s21 = smov %s696_s22 }
 0x2a0   : > { %s893_s22 = smov %s895_s25  ;;  %17 = sbr.rel (!%p15_p9) target bundleno = 4 (0x4), region = 88 }
 0x2a7   :  { %469 = vsyncpa [#allocation4], 1 }
 0x2a8   :  { %471 = vsyncpa [#allocation4 + $0x1], 1 }

</bundles_post_ra>
